<compile_context>
chip_gen: v7x
topology: tpu7x:2x2x1
jax: 0.10.0
libtpu: 0.0.40
codegen_flags: <defaults>
</compile_context>

<pallas_src>
import functools

import jax
import jax.numpy as jnp
from jax import lax
from jax.experimental import pallas as pl
from jax.experimental.pallas import tpu as pltpu

LANES = 128                  # vreg lane width (last dim)
ACC_ROWS = 32                # VMEM accumulator rows (4 sublane tiles -> 4 add chains)
ROW_ALIGN = 32               # block_rows multiple: covers f32/bf16/int8 packing + ACC_ROWS
MIN_CORE_ROWS = 512          # ~85% of HBM roofline; min rows per core before splitting
TARGET_BLOCK_BYTES = 2 * 1024 * 1024  # per-input per-step DMA size (byte-based)


def _round_up(v, m):
    return ((v + m - 1) // m) * m


def _num_tensorcores():
    """Best-effort TensorCores per jax device (v5e/v6e/v2/v3 -> 1, v4/v5p/v7x -> 2)."""
    try:
        kind = jax.devices()[0].device_kind.lower()
    except Exception:
        return 1
    for tag in ("v2", "v3", "v5e", "v5 lite", "v5lite", "v6e", "v6 lite", "v6lite", "lite"):
        if tag in kind:
            return 1
    return 2


def _charbonnier_kernel(x_ref, y_ref, out_ref, acc_ref, *, eps2, block_rows,
                        blocks_per_core, total_blocks, rows_total,
                        need_step_guard, need_row_mask):
    """One (block_rows, 128) tile: acc += partial sums of sqrt((x-y)^2 + eps^2)."""
    c = pl.program_id(0)   # partial-sum chunk ("parallel": megacore split)
    j = pl.program_id(1)   # reduction axis within this core's chunk ("arbitrary")

    @pl.when(j == 0)
    def _():
        acc_ref[...] = jnp.zeros_like(acc_ref)

    def _accumulate():
        diff = x_ref[...].astype(jnp.float32) - y_ref[...].astype(jnp.float32)
        val = jnp.sqrt(diff * diff + eps2)
        if need_row_mask:
            # Ragged final block: zero rows past the valid row count. Geometry
            # is static, so this only traces a couple of VALU ops per block.
            linear = c * blocks_per_core + j
            row_ids = linear * block_rows + lax.broadcasted_iota(
                jnp.int32, (block_rows, LANES), 0)
            val = jnp.where(row_ids < rows_total, val, 0.0)
        # (block_rows,128) -> (32,128): tile-aligned reshape; 4 independent
        # sublane-tile add chains (pure VALU, hides under the DMA).
        acc_ref[...] += jnp.sum(val.reshape(-1, ACC_ROWS, LANES), axis=0)

    if need_step_guard:
        # Ghost steps (blocks past the end when total_blocks % ncores != 0):
        # the index_map clamps their DMA to the last real block, and we skip
        # their contribution entirely here.
        @pl.when(c * blocks_per_core + j < total_blocks)
        def _():
            _accumulate()
    else:
        _accumulate()

    @pl.when(j == blocks_per_core - 1)
    def _():
        out_ref[0, 0] = jnp.sum(acc_ref[...])


def charbonnier_loss(x, y, eps=1e-3, *, target_block_bytes=TARGET_BLOCK_BYTES,
                     ncores=None):
    """Pallas implementation of CharbonnierLoss.forward(x, y)."""
    assert x.shape == y.shape, (x.shape, y.shape)
    n = x.size
    assert n > 0, "empty input"
    eps = float(eps)
    eps2 = eps * eps

    xf = x.reshape(-1)
    yf = y.reshape(-1)
    itemsize = max(jnp.dtype(x.dtype).itemsize, jnp.dtype(y.dtype).itemsize)

    rows_exact = pl.cdiv(n, LANES)

    # Byte-based block cap: same DMA bytes per step for f32 / bf16 / int8.
    target_rows = max(ROW_ALIGN,
                      (target_block_bytes // (LANES * itemsize)) // ROW_ALIGN * ROW_ALIGN)
    block_rows = min(target_rows, _round_up(rows_exact, ROW_ALIGN))

    # Megacore split: only when the hardware has 2 TensorCores and each core
    # gets a roofline-sized chunk; shrink blocks so mid-size inputs still split.
    if ncores is None:
        ncores = 2 if (_num_tensorcores() >= 2 and rows_exact >= 2 * MIN_CORE_ROWS) else 1
    ncores = max(1, int(ncores))
    if ncores > 1:
        block_rows = min(block_rows, _round_up(pl.cdiv(rows_exact, ncores), ROW_ALIGN))

    # Lane padding. Common case (n % 128 == 0, n >= one block): zero-copy
    # reshape, ragged final block handled in-kernel. Tiny inputs are padded to
    # exactly one block; the padded zeros' exact contribution is subtracted.
    if rows_exact <= block_rows:
        padded = block_rows * LANES
    else:
        padded = rows_exact * LANES
    pad = padded - n
    if pad:
        xf = jnp.pad(xf, (0, pad))
        yf = jnp.pad(yf, (0, pad))
    rows_total = padded // LANES
    x2d = xf.reshape(rows_total, LANES)
    y2d = yf.reshape(rows_total, LANES)

    total_blocks = pl.cdiv(rows_total, block_rows)
    ncores = min(ncores, total_blocks)
    blocks_per_core = pl.cdiv(total_blocks, ncores)
    need_step_guard = ncores * blocks_per_core != total_blocks
    need_row_mask = total_blocks * block_rows != rows_total

    kernel = functools.partial(
        _charbonnier_kernel, eps2=eps2, block_rows=block_rows,
        blocks_per_core=blocks_per_core, total_blocks=total_blocks,
        rows_total=rows_total, need_step_guard=need_step_guard,
        need_row_mask=need_row_mask)

    if need_step_guard:
        def in_index_map(c, j, _bpc=blocks_per_core, _last=total_blocks - 1):
            return (jnp.minimum(c * _bpc + j, _last), 0)   # clamp ghost-step DMA
    else:
        def in_index_map(c, j, _bpc=blocks_per_core):
            return (c * _bpc + j, 0)

    in_spec = pl.BlockSpec((block_rows, LANES), in_index_map)

    block_bytes = block_rows * LANES * itemsize
    # 2 inputs x 2 pipeline buffers + accumulator, with headroom; never below
    # the 32 MiB scoped default of v6e/v7x (raises v5e's 16 MiB default).
    vmem_limit_bytes = max(32 << 20, 2 * 2 * block_bytes + (8 << 20))

    cost = pl.CostEstimate(
        flops=5 * padded,
        transcendentals=padded,
        bytes_accessed=2 * padded * itemsize + ncores * 4,
    )

    partials = pl.pallas_call(
        kernel,
        out_shape=jax.ShapeDtypeStruct((ncores, 1), jnp.float32),
        grid_spec=pltpu.PrefetchScalarGridSpec(
            num_scalar_prefetch=0,
            grid=(ncores, blocks_per_core),
            in_specs=[in_spec, in_spec],
            out_specs=pl.BlockSpec((1, 1), lambda c, j: (c, 0),
                                   memory_space=pltpu.SMEM),
            scratch_shapes=[pltpu.VMEM((ACC_ROWS, LANES), jnp.float32)],
        ),
        compiler_params=pltpu.CompilerParams(
            dimension_semantics=("parallel", "arbitrary"),
            vmem_limit_bytes=vmem_limit_bytes,
        ),
        cost_estimate=cost,
    )(x2d, y2d)

    total = jnp.sum(partials)
    if pad:
        # Padded zeros each contribute exactly sqrt(eps^2) = eps in f32.
        total = total - jnp.float32(pad * eps)
    return (total / jnp.float32(n)).astype(jnp.float32)


if __name__ == "__main__":
    key = jax.random.PRNGKey(0)
    kx, ky = jax.random.split(key)

    def ref_loss(x, y, eps=1e-3):
        d = x.astype(jnp.float32) - y.astype(jnp.float32)
        return jnp.mean(jnp.sqrt(d * d + eps * eps))

    # 1) Module-shaped small NCHW input, default block geometry (pad-to-block path).
    x = jax.random.normal(kx, (2, 4, 16, 16), dtype=jnp.float32)
    y = jax.random.normal(ky, (2, 4, 16, 16), dtype=jnp.float32)
    out = jax.block_until_ready(charbonnier_loss(x, y, eps=1e-3))
    assert jnp.allclose(out, ref_loss(x, y), rtol=1e-4, atol=1e-6), (out, ref_loss(x, y))

    # 2) Lane-unaligned input exercising the in-kernel ragged-final-block mask.
    x2 = jax.random.normal(kx, (2, 3, 33, 40), dtype=jnp.float32)
    y2 = jax.random.normal(ky, (2, 3, 33, 40), dtype=jnp.float32)
    out2 = jax.block_until_ready(
        charbonnier_loss(x2, y2, eps=1e-3, target_block_bytes=16 * 1024))
    assert jnp.allclose(out2, ref_loss(x2, y2), rtol=1e-4, atol=1e-6), (out2, ref_loss(x2, y2))

    # 3) Odd block count split over 2 partial-sum chunks (ghost-step guard path);
    #    runs fine on single-TensorCore chips too (leading axis is just a loop).
    x3 = jax.random.normal(kx, (2, 2, 24, 128), dtype=jnp.float32)
    y3 = jax.random.normal(ky, (2, 2, 24, 128), dtype=jnp.float32)
    out3 = jax.block_until_ready(
        charbonnier_loss(x3, y3, eps=1e-3, target_block_bytes=16 * 1024, ncores=2))
    assert jnp.allclose(out3, ref_loss(x3, y3), rtol=1e-4, atol=1e-6), (out3, ref_loss(x3, y3))

    print("KERNEL_OK")
</pallas_src>

<mosaic_0001>
module attributes {stable_mosaic.version = 11 : i64} {
  func.func @_charbonnier_kernel(%arg0: i32, %arg1: i32, %arg2: memref<32x128xf32, #tpu.memory_space<vmem>>, %arg3: memref<32x128xf32, #tpu.memory_space<vmem>>, %arg4: memref<1x1xf32, #tpu.memory_space<smem>>, %arg5: memref<32x128xf32, #tpu.memory_space<vmem>>) attributes {dimension_semantics = [#tpu.dimension_semantics<parallel>, #tpu.dimension_semantics<arbitrary>], iteration_bounds = array<i64: 1, 1>, scalar_prefetch = 0 : i64, scratch_operands = 1 : i64, tpu.core_type = #tpu.core_type<tc>, window_params = [{transform_indices = @transform_0, window_bounds = array<i64: 32, 128>}, {transform_indices = @transform_1, window_bounds = array<i64: 32, 128>}, {transform_indices = @transform_2, window_bounds = array<i64: 1, 1>}]} {
    %c0_i32 = arith.constant 0 : i32
    %0 = arith.cmpi eq, %arg1, %c0_i32 : i32
    %1 = arith.extui %0 : i1 to i32
    %c0_i32_0 = arith.constant 0 : i32
    %2 = arith.cmpi ne, %1, %c0_i32_0 : i32
    scf.if %2 {
      %cst_11 = arith.constant 0.000000e+00 : f32
      %18 = vector.broadcast %cst_11 : f32 to vector<32x128xf32>
      %c0_12 = arith.constant 0 : index
      %c0_13 = arith.constant 0 : index
      %19 = vector.load %arg5[%c0_12, %c0_13] : memref<32x128xf32, #tpu.memory_space<vmem>>, vector<32x128xf32>
      tpu.vector_store %arg5[%c0_12, %c0_13], %18 {strides = array<i32>} : memref<32x128xf32, #tpu.memory_space<vmem>>, vector<32x128xf32>,
    } else {
    }
    %c0 = arith.constant 0 : index
    %c0_1 = arith.constant 0 : index
    %3 = vector.load %arg2[%c0, %c0_1] : memref<32x128xf32, #tpu.memory_space<vmem>>, vector<32x128xf32>
    %c0_2 = arith.constant 0 : index
    %c0_3 = arith.constant 0 : index
    %4 = vector.load %arg3[%c0_2, %c0_3] : memref<32x128xf32, #tpu.memory_space<vmem>>, vector<32x128xf32>
    %5 = arith.subf %3, %4 : vector<32x128xf32>
    %6 = arith.mulf %5, %5 : vector<32x128xf32>
    %cst = arith.constant 9.99999997E-7 : f32
    %7 = vector.broadcast %cst : f32 to vector<32x128xf32>
    %8 = arith.addf %6, %7 : vector<32x128xf32>
    %9 = math.sqrt %8 : vector<32x128xf32>
    %c0_4 = arith.constant 0 : index
    %c0_5 = arith.constant 0 : index
    %10 = vector.load %arg5[%c0_4, %c0_5] : memref<32x128xf32, #tpu.memory_space<vmem>>, vector<32x128xf32>
    %11 = vector.shape_cast %9 : vector<32x128xf32> to vector<1x32x128xf32>
    %cst_6 = arith.constant dense<0.000000e+00> : vector<32x128xf32>
    %12 = vector.multi_reduction <add>, %11, %cst_6 [0] : vector<1x32x128xf32> to vector<32x128xf32>
    %13 = arith.addf %10, %12 : vector<32x128xf32>
    %c0_7 = arith.constant 0 : index
    %c0_8 = arith.constant 0 : index
    %14 = vector.load %arg5[%c0_7, %c0_8] : memref<32x128xf32, #tpu.memory_space<vmem>>, vector<32x128xf32>
    tpu.vector_store %arg5[%c0_7, %c0_8], %13 {strides = array<i32>} : memref<32x128xf32, #tpu.memory_space<vmem>>, vector<32x128xf32>,
    %c0_i32_9 = arith.constant 0 : i32
    %15 = arith.cmpi eq, %arg1, %c0_i32_9 : i32
    %16 = arith.extui %15 : i1 to i32
    %c0_i32_10 = arith.constant 0 : i32
    %17 = arith.cmpi ne, %16, %c0_i32_10 : i32
    scf.if %17 {
      %c0_11 = arith.constant 0 : index
      %c0_12 = arith.constant 0 : index
      %18 = vector.load %arg5[%c0_11, %c0_12] : memref<32x128xf32, #tpu.memory_space<vmem>>, vector<32x128xf32>
      %19 = vector.shape_cast %18 : vector<32x128xf32> to vector<1x32x128xf32>
      %cst_13 = arith.constant dense<0.000000e+00> : vector<1xf32>
      %20 = vector.multi_reduction <add>, %19, %cst_13 [1, 2] : vector<1x32x128xf32> to vector<1xf32>
      %21 = vector.shape_cast %20 : vector<1xf32> to vector<1x1x1xf32>
      %22 = vector.extract %21[0, 0, 0] : f32 from vector<1x1x1xf32>
      %c0_14 = arith.constant 0 : index
      %c0_15 = arith.constant 0 : index
      %23 = memref.load %arg4[%c0_14, %c0_15] : memref<1x1xf32, #tpu.memory_space<smem>>
      memref.store %22, %arg4[%c0_14, %c0_15] : memref<1x1xf32, #tpu.memory_space<smem>>
    } else {
    }
    return
  }
  func.func @transform_0(%arg0: i32, %arg1: i32) -> (i32, i32) {
    %c1_i32 = arith.constant 1 : i32
    %0 = arith.muli %arg0, %c1_i32 : i32
    %1 = arith.addi %0, %arg1 : i32
    %c0_i32 = arith.constant 0 : i32
    %c0_i32_0 = arith.constant 0 : i32
    return %1, %c0_i32 : i32, i32
  }
  func.func @transform_1(%arg0: i32, %arg1: i32) -> (i32, i32) {
    %c1_i32 = arith.constant 1 : i32
    %0 = arith.muli %arg0, %c1_i32 : i32
    %1 = arith.addi %0, %arg1 : i32
    %c0_i32 = arith.constant 0 : i32
    %c0_i32_0 = arith.constant 0 : i32
    return %1, %c0_i32 : i32, i32
  }
  func.func @transform_2(%arg0: i32, %arg1: i32) -> (i32, i32) {
    %c0_i32 = arith.constant 0 : i32
    %c0_i32_0 = arith.constant 0 : i32
    return %arg0, %c0_i32 : i32, i32
  }
}

</mosaic_0001>

<bundles_post_ra>
// kernel: tpu_custom_call.1
= control target key start
LH: loop header
LB: loop body
LE: loop exit
PB: predicated region body
PF: predicated region fallthrough
CT: control target
= control target key end

     0   :  { %7 = vsyncpa [#allocation4], 0  ;;  %s293_s0 = inlined_call_operand.hbm [shape: f32[32,128], index: 0, kind: input, shape index: {}]   ;;  %s294_s1 = inlined_call_operand.hbm [shape: f32[32,128], index: 1, kind: input, shape index: {}]   ;;  %s295_s2 = inlined_call_operand.hbm [shape: f32[1,1], index: 2, kind: output, shape index: {}]  }
   0x1   :  { %8 = vsyncpa [#allocation7], 0 }
   0x2   :  { %9 = vsyncpa [#allocation5], 0  ;;  %s235_s9 = smov [#allocation3]   ;;  %s175_s13 = scalar_lea.hbm %s293_s0, 512 }
   0x3   :  { %s19_s10 = sshll.u32 %s235_s9, 4  ;;  %p176_p0 = scmp.ne.s32.totalorder %s293_s0, %s175_s13  ;;  %s20_s10 = int_to_ptr.vmem [resolvable:$true] %s19_s10 }
   0x4   :  { %p179_p1 = scmp.lt.u32.totalorder %s175_s13, %s293_s0 }
   0x6   :  { %p181_p2 = pnand %p179_p1, %p176_p0 }
   0x8   :  { %184 = shalt.err (!%p181_p2)
}
   0x9   :  { %s185_s18 = scalar_lea.vmem %s20_s10, 512  ;;  %p190_p4 = scmp.lt.s32.totalorder %s20_s10, %s20_s10 }
   0xa   :  { %p186_p3 = scmp.ne.s32.totalorder %s20_s10, %s185_s18  ;;  %p191_p5 = scmp.lt.s32.totalorder %s185_s18, %s185_s18 }
   0xc   :  { %p192_p6 = por %p191_p5, %p190_p4 }
   0xe   :  { %p193_p7 = pnand %p192_p6, %p186_p3 }
  0x10   :  { %196 = shalt.err (!%p193_p7)
}
  0x11   :  { %s236_s19 = smov 128   ;;  %s237_s20 = smov 8  }
  0x12   :  { %25 = dma.hbm_to_vmem [thread:$0]  %s293_s0, 512, %s20_s10, [#allocation4], %s236_s19, %s236_s19, %s237_s20  }
  0x13   :  { %s238_s23 = smov [#allocation6]   ;;  %s197_s27 = scalar_lea.hbm %s294_s1, 512 }
  0x14   :  { %s35_s24 = sshll.u32 %s238_s23, 4  ;;  %p198_p8 = scmp.ne.s32.totalorder %s294_s1, %s197_s27  ;;  %s36_s24 = int_to_ptr.vmem [resolvable:$true] %s35_s24 }
  0x15   :  { %p201_p9 = scmp.lt.u32.totalorder %s197_s27, %s294_s1 }
  0x17   :  { %p203_p10 = pnand %p201_p9, %p198_p8 }
  0x19   :  { %206 = shalt.err (!%p203_p10)
}
  0x1a   :  { %s207_s4 = scalar_lea.vmem %s36_s24, 512  ;;  %p212_p12 = scmp.lt.s32.totalorder %s36_s24, %s36_s24 }
  0x1b   :  { %p208_p11 = scmp.ne.s32.totalorder %s36_s24, %s207_s4  ;;  %p213_p13 = scmp.lt.s32.totalorder %s207_s4, %s207_s4 }
  0x1d   :  { %p214_p0 = por %p213_p13, %p212_p12 }
  0x1f   :  { %p215_p1 = pnand %p214_p0, %p208_p11 }
  0x21   :  { %218 = shalt.err (!%p215_p1)
}
  0x22   :  { %41 = dma.hbm_to_vmem [thread:$0]  %s294_s1, 512, %s36_s24, [#allocation7], %s236_s19, %s236_s19, %s237_s20  }
  0x23   :  { %229 = dma.done.wait [#allocation4], 512  }
  0x24   :  { %230 = vsyncadd [#allocation4], 4294966784 }
  0x25   :  { %231 = dma.done.wait [#allocation7], 512  }
  0x26   :  { %232 = vsyncadd [#allocation7], 4294966784  ;;  %v60_v0 = vld [vmem:[#allocation3] sm:$0xff]  ;;  %v61_v1 = vld [vmem:[#allocation3 + $0x8] sm:$0xff]  ;;  %s219_s8 = scalar_lea.hbm %s295_s2, 16 }
  0x27   :  { %v62_v2 = vld [vmem:[#allocation3 + $0x10] sm:$0xff]  ;;  %v63_v3 = vld [vmem:[#allocation3 + $0x18] sm:$0xff]  ;;  %v64_v4 = vld [vmem:[#allocation6] sm:$0xff]  ;;  %p220_p2 = scmp.ne.s32.totalorder %s295_s2, %s219_s8  ;;  %p223_p3 = scmp.lt.u32.totalorder %s219_s8, %s295_s2 }
  0x28   :  { %v65_v5 = vld [vmem:[#allocation6 + $0x8] sm:$0xff]  ;;  %v66_v6 = vld [vmem:[#allocation6 + $0x10] sm:$0xff]  ;;  %v67_v7 = vld [vmem:[#allocation6 + $0x18] sm:$0xff]  ;;  %v68_v8 = vsub.f32 %v60_v0, %v64_v4 }
  0x29   :  { %v69_v9 = vsub.f32 %v61_v1, %v65_v5  ;;  %v70_v10 = vsub.f32 %v62_v2, %v66_v6  ;;  %v71_v11 = vsub.f32 %v63_v3, %v67_v7  ;;  %p225_p4 = pnand %p223_p3, %p220_p2 }
  0x2a   :  { %v72_v12 = vmul.f32 %v68_v8, %v68_v8 }
  0x2b   :  { %v73_v13 = vmul.f32 %v69_v9, %v69_v9  ;;  %v74_v14 = vmul.f32 %v70_v10, %v70_v10  ;;  %v75_v15 = vmul.f32 %v71_v11, %v71_v11 }
  0x2c   :  { %v76_v16 = vadd.f32 1e-06, %v72_v12 }
  0x2d   :  { %v77_v17 = vadd.f32 1e-06, %v73_v13  ;;  %v78_v18 = vadd.f32 1e-06, %v74_v14  ;;  %v79_v19 = vadd.f32 1e-06, %v75_v15 }
  0x2e   :  { %167 = vrsqrt.f32 %v76_v16  ;;  %vm82_vm0 = vcmp.eq.f32.partialorder %v76_v16, inf  ;;  %vm84_vm1 = vcmp.eq.f32.partialorder %v76_v16, 0.0  ;;  %v85_v21 = vand.u32 2147483648, %v76_v16 }
  0x2f   :  { %169 = vrsqrt.f32 %v77_v17  ;;  %vm89_vm2 = vcmp.eq.f32.partialorder %v77_v17, inf  ;;  %vm91_vm3 = vcmp.eq.f32.partialorder %v77_v17, 0.0  ;;  %v92_v24 = vand.u32 2147483648, %v77_v17 }
  0x30   :  { %171 = vrsqrt.f32 %v78_v18  ;;  %vm96_vm4 = vcmp.eq.f32.partialorder %v78_v18, inf  ;;  %vm98_vm5 = vcmp.eq.f32.partialorder %v78_v18, 0.0  ;;  %v99_v27 = vand.u32 2147483648, %v78_v18 }
  0x31   :  { %173 = vrsqrt.f32 %v79_v19  ;;  %vm103_vm6 = vcmp.eq.f32.partialorder %v79_v19, inf  ;;  %v106_v31 = vand.u32 2147483648, %v79_v19  ;;  %vm105_vm7 = vcmp.eq.f32.partialorder %v79_v19, 0.0 }
  0x38   :  { %v168_v20 = vpop.eup %167 }
  0x39   :  { %v170_v22 = vpop.eup %169  ;;  %v81_v23 = vmul.f32 %v168_v20, %v76_v16 }
  0x3a   :  { %v172_v25 = vpop.eup %171  ;;  %v88_v26 = vmul.f32 %v170_v22, %v77_v17 }
  0x3b   :  { %v174_v28 = vpop.eup %173  ;;  %v83_v29 = vsel %vm82_vm0, %v76_v16, %v81_v23  ;;  %v95_v30 = vmul.f32 %v172_v25, %v78_v18 }
  0x3c   :  { %v86_v32 = vsel %vm84_vm1, %v85_v21, %v83_v29  ;;  %v90_v33 = vsel %vm89_vm2, %v77_v17, %v88_v26  ;;  %v102_v34 = vmul.f32 %v174_v28, %v79_v19 }
  0x3d   :  { %v93_v35 = vsel %vm91_vm3, %v92_v24, %v90_v33  ;;  %v97_v36 = vsel %vm96_vm4, %v78_v18, %v95_v30 }
  0x3e   :  { %v100_v37 = vsel %vm98_vm5, %v99_v27, %v97_v36  ;;  %v104_v38 = vsel %vm103_vm6, %v79_v19, %v102_v34  ;;  %v131_v39 = vadd.f32 %v93_v35, %v86_v32 }
  0x3f   :  { %v107_v40 = vsel %vm105_vm7, %v106_v31, %v104_v38 }
  0x40   :  { %v132_v41 = vadd.f32 %v131_v39, %v100_v37 }
  0x42   :  { %v133_v42 = vadd.f32 %v132_v41, %v107_v40 }
  0x44   :  { %134 = vadd.xlane.f32.xlu0 %v133_v42 }
  0xd1   :  { %v135_v43 = vpop.xlane.xlu0 %134 }
  0xd2   :  { %v136_v44 = vrot.slane %v135_v43, 4 }
  0xd4   :  { %v137_v45 = vadd.f32 %v136_v44, %v135_v43 }
  0xd6   :  { %v138_v46 = vrot.slane %v137_v45, 2 }
  0xd8   :  { %v139_v47 = vadd.f32 %v138_v46, %v137_v45 }
  0xda   :  { %v140_v48 = vrot.slane %v139_v47, 1 }
  0xdc   :  { %v141_v49 = vadd.f32 %v140_v48, %v139_v47 }
  0xde   :  { %160 = vpush %v141_v49 }
 0x10f   :  { %s161_s1 = spop %160 }
 0x110   :  { %144 = sst [smem:[#allocation8]] %s161_s1 }
 0x111   :  { %228 = shalt.err (!%p225_p4)
}
 0x112   :  { %s239_s13 = smov [#allocation8]  }
 0x113   :  { %152 = dma.smem_to_hbm %s239_s13, 16, %s295_s2, [#allocation5]  }
 0x114   :  { %233 = dma.done.wait [#allocation5], 16  }
 0x115   :  { %234 = vsyncadd [#allocation5], 4294967280 }
 0x116   :  { %156 = sfence }
 0x117   :  { %157 = vsyncpa [#allocation4], 1 }
 0x118   :  { %158 = vsyncpa [#allocation7], 1 }
 0x119   :  { %159 = vsyncpa [#allocation5], 1 }

</bundles_post_ra>
